<compile_context>
chip_gen: v6e
topology: v6e:2x2x1
jax: 0.10.0
libtpu: 0.0.40
codegen_flags: <defaults>
</compile_context>

<pallas_src>
import jax
import jax.numpy as jnp
import numpy as np
from jax.experimental import pallas as pl
from jax.experimental.pallas import tpu as pltpu


def _pi_value_head_kernel(pi_ref, invalid_ref, value_ref, w_ref, mult_ref, b_ref,
                          pi_out_ref, v_out_ref):
    # --- pi = pi.float(); pi[invalid] = -inf   (elementwise on the VPU) ---
    invalid = invalid_ref[...] != 0                               # (TB, A) int8 -> bool
    pi_f32 = pi_ref[...].astype(jnp.float32)                      # .float()
    pi_out_ref[...] = jnp.where(invalid, -jnp.inf, pi_f32)

    # --- v = Linear(value.float()) with out_features == 1 ---
    # mat-vec as broadcast-multiply + lane reduce; MXU deliberately unused.
    value_f32 = value_ref[...].astype(jnp.float32)                # (TB, F)
    prod = value_f32 * w_ref[...]                                 # (TB, F) * (1, F)
    v = jnp.sum(prod, axis=1, keepdims=True) + b_ref[0, 0]        # (TB, 1) + scalar (SMEM)

    # --- v.transpose(0,1) * multiplier, kept column-major per tile ---
    v_out_ref[...] = v * mult_ref[...]                            # (TB, 1)


def _pick_batch_tile(B, A, F, pi_bytes, value_bytes,
                     budget_bytes=16 * 1024 * 1024, max_rows=1024):
    """Largest batch tile (multiple of 8, dividing B, or B itself) whose
    double-buffered VMEM footprint fits the budget."""
    per_row = 2 * (A * (pi_bytes + 1 + 4)     # pi in + int8 mask + f32 pi_out (x2 double-buffer)
                   + F * value_bytes          # value in
                   + 2 * 4)                   # multiplier column + v column
    cap = max(8, budget_bytes // max(per_row, 1))
    cap = min(cap, max_rows)
    if B <= cap:
        return B
    tb = (cap // 8) * 8
    while tb >= 8:
        if B % tb == 0:
            return tb
        tb -= 8
    return B  # fall back to a single block


def pi_value_head(pi, value, invalid, multiplier, weight, bias, *, batch_tile=None):
    """Pallas equivalent of PiValueHead.forward(pi, value, invalid, multiplier)."""
    B, A = pi.shape
    _, F = value.shape

    # --- layout / dtype glue only (no compute) ---
    invalid_i8 = invalid.astype(jnp.int8)                         # 1 B/elem mask stream
    mult_col = jnp.asarray(multiplier, jnp.float32).reshape(B, 1)
    weight_2d = jnp.asarray(weight, jnp.float32).reshape(1, F)
    bias_2d = jnp.asarray(bias, jnp.float32).reshape(1, 1)

    if batch_tile is None:
        batch_tile = _pick_batch_tile(B, A, F, pi.dtype.itemsize, value.dtype.itemsize)
    tb = batch_tile
    grid = (pl.cdiv(B, tb),)

    pi_out, v_col = pl.pallas_call(
        _pi_value_head_kernel,
        out_shape=(jax.ShapeDtypeStruct((B, A), jnp.float32),
                   jax.ShapeDtypeStruct((B, 1), jnp.float32)),
        grid=grid,
        in_specs=[
            pl.BlockSpec((tb, A), lambda i: (i, 0)),              # pi            (A kept full-extent / lane-dense)
            pl.BlockSpec((tb, A), lambda i: (i, 0)),              # invalid, int8
            pl.BlockSpec((tb, F), lambda i: (i, 0)),              # value         (F=32 must stay full-extent)
            pl.BlockSpec((1, F), lambda i: (0, 0)),               # weight row, reused each step
            pl.BlockSpec((tb, 1), lambda i: (i, 0)),              # multiplier column
            pl.BlockSpec(memory_space=pltpu.MemorySpace.SMEM),    # bias scalar in SMEM
        ],
        out_specs=(
            pl.BlockSpec((tb, A), lambda i: (i, 0)),              # masked pi
            pl.BlockSpec((tb, 1), lambda i: (i, 0)),              # v column
        ),
        compiler_params=pltpu.CompilerParams(
            dimension_semantics=("parallel",)),                   # megacore sharding on v7x
    )(pi, invalid_i8, value, weight_2d, mult_col, bias_2d)

    # v.transpose(0, 1): (B, 1) -> (1, B) has identical flat order -> pure reshape.
    v = v_col.reshape(1, B)
    return pi_out, v


if __name__ == "__main__":
    B, A, F = 16, 128, 32   # batch, num actions (pi width), in_feat for the value head

    key = jax.random.PRNGKey(0)
    k_pi, k_val, k_inv, k_mul, k_w, k_b = jax.random.split(key, 6)

    # Inputs (pi / value arrive in half precision; kernel applies the .float() casts)
    pi = jax.random.normal(k_pi, (B, A), dtype=jnp.bfloat16)
    value = jax.random.normal(k_val, (B, F), dtype=jnp.bfloat16)
    invalid = jax.random.bernoulli(k_inv, p=0.25, shape=(B, A))          # bool mask
    multiplier = jax.random.uniform(k_mul, (B,), jnp.float32, 0.5, 1.5)

    # Deterministic nn.Linear(in_feat, 1) init: U(-1/sqrt(F), 1/sqrt(F))
    bound = 1.0 / np.sqrt(F)
    weight = jax.random.uniform(k_w, (1, F), jnp.float32, -bound, bound)
    bias = jax.random.uniform(k_b, (1,), jnp.float32, -bound, bound)

    # batch_tile=8 forces a 2-step batch grid at demo size to exercise the tiled path.
    pi_out, v_out = jax.block_until_ready(
        pi_value_head(pi, value, invalid, multiplier, weight, bias, batch_tile=8))

    # Pure-JAX reference of the PyTorch forward
    pi_ref = jnp.where(invalid, -jnp.inf, pi.astype(jnp.float32))
    v_lin = value.astype(jnp.float32) @ weight.T + bias                  # (B, 1)
    v_ref = v_lin.T * multiplier                                         # (1, B)

    assert pi_out.shape == (B, A) and pi_out.dtype == jnp.float32
    assert v_out.shape == (1, B) and v_out.dtype == jnp.float32
    np.testing.assert_allclose(np.asarray(pi_out), np.asarray(pi_ref), rtol=1e-6)
    np.testing.assert_allclose(np.asarray(v_out), np.asarray(v_ref), rtol=1e-5, atol=1e-6)

    print("KERNEL_OK")
</pallas_src>

<mosaic_0001>
module attributes {stable_mosaic.version = 11 : i64} {
  func.func @_pi_value_head_kernel(%arg0: i32, %arg1: memref<8x128xbf16, #tpu.memory_space<vmem>>, %arg2: memref<8x128xi8, #tpu.memory_space<vmem>>, %arg3: memref<8x32xbf16, #tpu.memory_space<vmem>>, %arg4: memref<1x32xf32, #tpu.memory_space<vmem>>, %arg5: memref<8x1xf32, #tpu.memory_space<vmem>>, %arg6: memref<1x1xf32, #tpu.memory_space<smem>>, %arg7: memref<8x128xf32, #tpu.memory_space<vmem>>, %arg8: memref<8x1xf32, #tpu.memory_space<vmem>>) attributes {dimension_semantics = [#tpu.dimension_semantics<parallel>], iteration_bounds = array<i64: 2>, scalar_prefetch = 0 : i64, scratch_operands = 0 : i64, tpu.core_type = #tpu.core_type<tc>, window_params = [{transform_indices = @transform_0, window_bounds = array<i64: 8, 128>}, {transform_indices = @transform_1, window_bounds = array<i64: 8, 128>}, {transform_indices = @transform_2, window_bounds = array<i64: 8, 32>}, {pipeline_mode = #tpu.pipeline_mode<synchronous>, transform_indices = @transform_3, window_bounds = array<i64: 1, 32>}, {transform_indices = @transform_4, window_bounds = array<i64: 8, 1>}, {transform_indices = @transform_5, window_bounds = array<i64: 1, 1>}, {transform_indices = @transform_6, window_bounds = array<i64: 8, 128>}, {transform_indices = @transform_7, window_bounds = array<i64: 8, 1>}]} {
    %c0 = arith.constant 0 : index
    %c0_0 = arith.constant 0 : index
    %0 = vector.load %arg2[%c0, %c0_0] : memref<8x128xi8, #tpu.memory_space<vmem>>, vector<8x128xi8>
    %c0_i8 = arith.constant 0 : i8
    %1 = vector.broadcast %c0_i8 : i8 to vector<8x128xi8>
    %2 = arith.cmpi ne, %0, %1 : vector<8x128xi8>
    %c0_1 = arith.constant 0 : index
    %c0_2 = arith.constant 0 : index
    %3 = vector.load %arg1[%c0_1, %c0_2] : memref<8x128xbf16, #tpu.memory_space<vmem>>, vector<8x128xbf16>
    %4 = arith.extf %3 : vector<8x128xbf16> to vector<8x128xf32>
    %cst = arith.constant 0xFF800000 : f32
    %5 = vector.broadcast %cst : f32 to vector<8x128xf32>
    %6 = arith.select %2, %5, %4 : vector<8x128xi1>, vector<8x128xf32>
    %c0_3 = arith.constant 0 : index
    %c0_4 = arith.constant 0 : index
    %7 = vector.load %arg7[%c0_3, %c0_4] : memref<8x128xf32, #tpu.memory_space<vmem>>, vector<8x128xf32>
    tpu.vector_store %arg7[%c0_3, %c0_4], %6 {strides = array<i32>} : memref<8x128xf32, #tpu.memory_space<vmem>>, vector<8x128xf32>,
    %c0_5 = arith.constant 0 : index
    %c0_6 = arith.constant 0 : index
    %8 = vector.load %arg3[%c0_5, %c0_6] : memref<8x32xbf16, #tpu.memory_space<vmem>>, vector<8x32xbf16>
    %9 = arith.extf %8 : vector<8x32xbf16> to vector<8x32xf32>
    %c0_7 = arith.constant 0 : index
    %c0_8 = arith.constant 0 : index
    %10 = vector.load %arg4[%c0_7, %c0_8] : memref<1x32xf32, #tpu.memory_space<vmem>>, vector<1x32xf32>
    %11 = vector.broadcast %10 : vector<1x32xf32> to vector<8x32xf32>
    %12 = arith.mulf %9, %11 : vector<8x32xf32>
    %cst_9 = arith.constant dense<0.000000e+00> : vector<8xf32>
    %13 = vector.multi_reduction <add>, %12, %cst_9 [1] : vector<8x32xf32> to vector<8xf32>
    %14 = vector.shape_cast %13 : vector<8xf32> to vector<8x1xf32>
    %c0_10 = arith.constant 0 : index
    %c0_11 = arith.constant 0 : index
    %15 = memref.load %arg6[%c0_10, %c0_11] : memref<1x1xf32, #tpu.memory_space<smem>>
    %16 = vector.broadcast %15 : f32 to vector<8x1xf32>
    %17 = arith.addf %14, %16 : vector<8x1xf32>
    %c0_12 = arith.constant 0 : index
    %c0_13 = arith.constant 0 : index
    %18 = vector.load %arg5[%c0_12, %c0_13] : memref<8x1xf32, #tpu.memory_space<vmem>>, vector<8x1xf32>
    %19 = arith.mulf %17, %18 : vector<8x1xf32>
    %c0_14 = arith.constant 0 : index
    %c0_15 = arith.constant 0 : index
    %20 = vector.load %arg8[%c0_14, %c0_15] : memref<8x1xf32, #tpu.memory_space<vmem>>, vector<8x1xf32>
    tpu.vector_store %arg8[%c0_14, %c0_15], %19 {strides = array<i32>} : memref<8x1xf32, #tpu.memory_space<vmem>>, vector<8x1xf32>,
    return
  }
  func.func @transform_0(%arg0: i32) -> (i32, i32) {
    %c0_i32 = arith.constant 0 : i32
    %c0_i32_0 = arith.constant 0 : i32
    return %arg0, %c0_i32 : i32, i32
  }
  func.func @transform_1(%arg0: i32) -> (i32, i32) {
    %c0_i32 = arith.constant 0 : i32
    %c0_i32_0 = arith.constant 0 : i32
    return %arg0, %c0_i32 : i32, i32
  }
  func.func @transform_2(%arg0: i32) -> (i32, i32) {
    %c0_i32 = arith.constant 0 : i32
    %c0_i32_0 = arith.constant 0 : i32
    return %arg0, %c0_i32 : i32, i32
  }
  func.func @transform_3(%arg0: i32) -> (i32, i32) {
    %c0_i32 = arith.constant 0 : i32
    %c0_i32_0 = arith.constant 0 : i32
    %c0_i32_1 = arith.constant 0 : i32
    return %c0_i32, %c0_i32_0 : i32, i32
  }
  func.func @transform_4(%arg0: i32) -> (i32, i32) {
    %c0_i32 = arith.constant 0 : i32
    %c0_i32_0 = arith.constant 0 : i32
    return %arg0, %c0_i32 : i32, i32
  }
  func.func @transform_5(%arg0: i32) -> (i32, i32) {
    %c0_i32 = arith.constant 0 : i32
    %c0_i32_0 = arith.constant 0 : i32
    %c0_i32_1 = arith.constant 0 : i32
    return %c0_i32, %c0_i32_0 : i32, i32
  }
  func.func @transform_6(%arg0: i32) -> (i32, i32) {
    %c0_i32 = arith.constant 0 : i32
    %c0_i32_0 = arith.constant 0 : i32
    return %arg0, %c0_i32 : i32, i32
  }
  func.func @transform_7(%arg0: i32) -> (i32, i32) {
    %c0_i32 = arith.constant 0 : i32
    %c0_i32_0 = arith.constant 0 : i32
    return %arg0, %c0_i32 : i32, i32
  }
}

</mosaic_0001>

<bundles_post_ra>
// kernel: tpu_custom_call.1
= control target key start
LH: loop header
LB: loop body
LE: loop exit
PB: predicated region body
PF: predicated region fallthrough
CT: control target
= control target key end

     0   :  { %s778_s0 = inlined_call_operand.vmem [shape: bf16[16,128], index: 0, kind: input, shape index: {}]   ;;  %s779_s1 = inlined_call_operand.vmem [shape: s8[16,128], index: 1, kind: input, shape index: {}]   ;;  %s780_s2 = inlined_call_operand.vmem [shape: bf16[16,32], index: 2, kind: input, shape index: {}]   ;;  %s781_s3 = inlined_call_operand.vmem [shape: f32[1,32], index: 3, kind: input, shape index: {}]   ;;  %s782_s4 = inlined_call_operand.vmem [shape: f32[16,1], index: 4, kind: input, shape index: {}]   ;;  %s783_s5 = inlined_call_operand.<no memory space> [shape: f32[1,1], index: 5, kind: input, shape index: {}]   ;;  %s784_s6 = inlined_call_operand.hbm [shape: f32[16,128], index: 6, kind: output, shape index: {0}]   ;;  %s785_s7 = inlined_call_operand.vmem [shape: f32[16,1], index: 7, kind: output, shape index: {1}]  }
   0x1   :  { %13 = sst [smem:[#allocation2]] %s783_s5 }
   0x2   :  { %14 = vsyncpa [#allocation4], 0 }
   0x3   :  { %16 = vsyncpa [#allocation4 + $0x1], 0  ;;  %s671_s26 = smov 0   ;;  %s673_s27 = smov 0  }
   0x4   :  { %s675_s28 = smov 0   ;;  %s677_s29 = smov 0  }
   0x5 LB: > { %s692_s5 = sadd.s32 4294967295, %s624_s29   ;;  %s509_s30 = sadd.s32 4294967294, %s624_s29   ;;  %s624_s29 = sphi %s677_s29, %s791_s29   ;;  %s620_s28 = sphi %s675_s28, %s790_s28   ;;  %s616_s27 = sphi %s673_s27, %s789_s27   ;;  %s612_s26 = sphi %s671_s26, %s788_s26  }
   0x6   : > { %s696_s8 = sadd.s32 1, %s624_s29   ;;  %s175_s9 = sadd.s32 1, %s620_s28 }
   0x7   : > { %s172_s10 = ssub.s32 %s624_s29, %s696_s8  ;;  %p185_p0 = scmp.ne.s32.totalorder %s620_s28, %s616_s27 }
   0x8   : > { %p173_p1 = scmp.eq.s32.totalorder %s172_s10, 0  ;;  %p186_p2 = scmp.eq.s32.totalorder %s692_s5, 1 }
   0x9   : > { %p191_p3 = scmp.ne.s32.totalorder %s616_s27, %s612_s26  ;;  %p192_p4 = scmp.eq.s32.totalorder %s509_s30, 1 }
   0xa   : > { %s707_s11 = scalar_select %p173_p1, %s620_s28, %s175_s9  }
   0xb   : > { %p709_p5 = por %p186_p2, %p185_p0  ;;  %p713_p6 = por %p192_p4, %p191_p3 }
   0xc   : > { %p512_p7 = scmp.ge.s32.totalorder %s624_s29, 1  ;;  %p270_p8 = scmp.lt.s32.totalorder %s624_s29, 3 }
   0xe   : > { %p271_p9 = pnand %p512_p7, %p270_p8 }
   0xf   : > { %p317_p10 = scmp.lt.s32.totalorder (!%p271_p9), %s692_s5, 1  ;;  %s308_s10 = sand.u32 (!%p271_p9), 1, %s616_s27  }
  0x10   : > { %274 = sbr.rel (%p271_p9) target bundleno = 174 (0xae), region = 44  ;;  %s513_s16 = sshll.u32 (!%p271_p9), %s308_s10, 3 }
  0x11   : > { %s521_s17 = sshll.u32 (!%p271_p9), %s692_s5, 7  ;;  %s370_s22 = scalar_lea.sflag (!%p271_p9), [#allocation4], %s308_s10 }
  0x12   : > { %s385_s21 = scalar_lea.hbm (!%p271_p9), %s784_s6, %s521_s17 }
  0x15   : > { %s721_s14 = scalar_select %p317_p10, %s692_s5, 1  ;;  %v519_v1 = vld [vmem:[%s781_s3] ss:$0 sm:$0xff]  ;;  %vm358_vm0 = vcmask 261120   ;;  %v626_v7 = vmov 0  }
  0x17   : > { %s514_s15 = sshll.u32 %s721_s14, 2  ;;  %s515_s24 = sshll.u32 %s721_s14, 1 }
  0x18   : > { %s328_s18 = scalar_lea.vmem %s780_s2, %s514_s15  ;;  %s320_s23 = scalar_lea.vmem %s778_s0, %s514_s15 }
  0x19   : > { %v348_v0 = vld [vmem:[%s328_s18] sm:$0xf]  ;;  %s324_s9 = scalar_lea.vmem %s779_s1, %s515_s24  ;;  %s310_s18 = scalar_lea.vmem [#allocation3], %s513_s16 }
  0x1a   : > { %v349_v2 = vunpack.c.l.bf16 %v348_v0  ;;  %v339_v5 = vld [vmem:[%s324_s9] sm:$0x3]  ;;  %s387_s15 = sshll.u32 %s310_s18, 4  ;;  %s627_s24 = smov [#allocation3]   ;;  %s388_s15 = int_to_ptr.vmem [resolvable:$true] %s387_s15 }
  0x1b   : > { %v341_v6 = vld [vmem:[%s320_s23] sm:$0xf]  ;;  %vm340_vm1 = vnez %v339_v5  ;;  %s564_s23 = scalar_lea.vmem %s388_s15, 128  ;;  %s568_s25 = sshll.u32 %s627_s24, 4  ;;  %s569_s25 = int_to_ptr.vmem [resolvable:$false] %s568_s25 }
  0x1c   : > { %v357_v3 = vmul.f32 %v519_v1, %v349_v2  ;;  %v343_v8 = vsel %vm340_vm1, 16843009, %v626_v7  ;;  %v342_v10 = vunpack.c.l.bf16 %v341_v6  ;;  %p565_p11 = scmp.ne.s32.totalorder %s388_s15, %s564_s23  ;;  %s570_s30 = scalar_lea.vmem %s569_s25, 256 }
  0x1d   : > { %v344_v9 = vunpack.c.0.s8 %v343_v8  ;;  %p571_p0 = scmp.lt.s32.totalorder %s388_s15, %s569_s25  ;;  %p572_p1 = scmp.lt.s32.totalorder %s570_s30, %s564_s23 }
  0x1e   : > { %v359_v4 = vsel %vm358_vm0, %v357_v3, 0.0  ;;  %p566_p12 = pnand %p565_p11, %p709_p5 }
  0x1f   : > { %360 = vadd.xlane.f32.xlu0 %v359_v4  ;;  %vm345_vm2 = vcmp.ne.s32.totalorder %v344_v9, 0  ;;  %p573_p2 = por %p572_p1, %p571_p0 }
  0x20   : > { %v346_v11 = vsel %vm345_vm2, -inf, %v342_v10  ;;  %p567_p13 = pneg %p566_p12 }
  0x21   : > { %347 = vst [vmem:[%s310_s18] sm:$0xff] %v346_v11 }
  0x22   : > { %p574_p3 = pnand %p573_p2, %p567_p13 }
  0x24   : > { %577 = shalt.err (!%p574_p3)
}
  0x25   : > { %s578_s5 = scalar_lea.hbm %s385_s21, 128  ;;  %s582_s16 = scalar_lea.hbm %s784_s6, 256 }
  0x26   : > { %p579_p4 = scmp.ne.s32.totalorder %s385_s21, %s578_s5  ;;  %p583_p9 = scmp.lt.s32.totalorder %s385_s21, %s784_s6 }
  0x27   : > { %p584_p10 = scmp.lt.s32.totalorder %s582_s16, %s578_s5 }
  0x28   : > { %p580_p7 = pnand %p579_p4, %p709_p5 }
  0x29   : > { %p585_p11 = por %p584_p10, %p583_p9 }
  0x2a   : > { %p581_p8 = pneg %p580_p7 }
  0x2c   : > { %p586_p12 = pnand %p585_p11, %p581_p8 }
  0x2e   : > { %589 = shalt.err (!%p586_p12)
}
  0x2f   : > { %524 = dma.vmem_to_hbm [thread:$0]  (%p709_p5), %s388_s15, 128, %s385_s21, %s370_s22   ;;  %vm367_vm3 = vcmask 7168  }
  0x30   : > { %s362_s19 = sld [smem:[#allocation2]]  ;;  %s517_s20 = sshll.u32 %s721_s14, 3 }
  0x31   : > { %s332_s25 = scalar_lea.vmem %s782_s4, %s517_s20  ;;  %s336_s5 = scalar_lea.vmem %s785_s7, %s517_s20 }
  0x32   : > { %v365_v14 = vld [vmem:[%s332_s25] sm:$0xff] }
  0x36   : > { %v363_v12 = vstv %s362_s19 }
  0xa8   : > { %v361_v13 = vpop.xlane.xlu0 %360 }
  0xa9   : > { %v364_v15 = vadd.f32 %v363_v12, %v361_v13 }
  0xab   : > { %v366_v16 = vmul.f32 %v365_v14, %v364_v15 }
  0xad   : > { %368 = vst.msk [vmem:[%s336_s5] sm:$0xff] %vm367_vm3, %v366_v16 }
  0xae PF: > { %p530_p5 = scmp.ge.s32.totalorder %s624_s29, 2  ;;  %s402_s12 = sand.u32 1, %s612_s26  }
  0xaf   : > { %s403_s14 = scalar_lea.sflag [#allocation4], %s402_s12 }
  0xb0   : > { %p527_p13 = pnand %p530_p5, %p713_p6 }
  0xb2   : > { %p528_p0 = pneg %p527_p13 }
  0xb4   : > { %607 = dma.done.wait (%p528_p0), %s403_s14, 128  }
  0xb5   : > { %609 = vsyncadd (%p528_p0), %s403_s14, 4294967168  ;;  %p19_p1 = scmp.ge.s32.totalorder %s696_s8, 4   ;;  %s788_s26 = smov %s616_s27 }
  0xb6   : > { %s789_s27 = smov %s620_s28  ;;  %s790_s28 = smov %s707_s11 }
  0xb7   : > { %s791_s29 = smov %s696_s8  ;;  %21 = sbr.rel (!%p19_p1) target bundleno = 5 (0x5), region = 100 }
  0xbc   :  { %415 = vsyncpa [#allocation4], 1 }
  0xbd   :  { %417 = vsyncpa [#allocation4 + $0x1], 1 }

</bundles_post_ra>
